<compile_context>
chip_gen: v5e
topology: v5e:2x2
jax: 0.10.0
libtpu: 0.0.40
codegen_flags: <defaults>
</compile_context>

<pallas_src>
import functools

import jax
import jax.numpy as jnp
from jax.experimental import pallas as pl
from jax.experimental.pallas import tpu as pltpu

BN_EPS = 1e-5    # nn.BatchNorm1d default eps
PD_EPS = 1e-6    # nn.PairwiseDistance default eps (added elementwise to the difference)
HID = 64         # Encoder hidden width (hard-coded in the PyTorch module)
HID_PAD = 128    # hidden width padded to a full lane tile
C_PAD = 128      # fc output columns padded to a full lane tile


def _contrastive_kernel(margin, batch, feat,
                        anchor_ref, pvec_ref, fill_ref, newfeat_ref,
                        wpack_ref, w2_ref,
                        posneg_ref, logits_ref, loss_ref):
    F = feat
    anchor = anchor_ref[...]                              # (B, F) f32

    # positive = anchor + pvec * fill
    #   default branch : pvec = vec[index]
    #   radius branch  : pvec = full(radius)
    #   'no_aug' branch: pvec = 0
    positive = anchor + pvec_ref[...] * fill_ref[...]

    # ---- unpack the packed parameter slab (all slices are static) -------------
    w1 = wpack_ref[0:F, :]                                # (F, 128)   Linear1 W (padded cols)
    wfc = wpack_ref[F:2 * F, :]                           # (F, 128)   fc W (padded cols)
    pr = wpack_ref[2 * F:2 * F + 8, :]                    # (8, 128)   row-packed 1-D params
    b1 = pr[0:1, :]                                       # (1, 128)
    gamma = pr[1:2, :]                                    # (1, 128)
    beta = pr[2:3, :]                                     # (1, 128)
    b2 = pr[3:4, :F]                                      # (1, F)
    bfc = pr[4:5, :]                                      # (1, 128)

    # ---- Encoder(new_feat): Linear -> ReLU -> BatchNorm1d (batch stats) -> Linear
    x = newfeat_ref[...]                                  # (B, F)
    z = jnp.dot(x, w1, preferred_element_type=jnp.float32) + b1     # (B, 128)
    z = jnp.maximum(z, 0.0)
    mu = jnp.mean(z, axis=0, keepdims=True)
    var = jnp.mean((z - mu) * (z - mu), axis=0, keepdims=True)       # biased variance
    z = (z - mu) * jax.lax.rsqrt(var + BN_EPS) * gamma + beta
    negative = jnp.dot(z, w2_ref[...], preferred_element_type=jnp.float32) + b2   # (B, F)

    # ---- lane-dense (B, 2F) output slab: positive | negative ------------------
    posneg_ref[...] = jnp.concatenate([positive, negative], axis=-1
                                      ).astype(posneg_ref.dtype)

    # ---- ContrastiveLoss: mean( ||a-p+eps||^2 + clamp(margin - ||a-n+eps||, 0)^2 )
    dpos = anchor - positive + PD_EPS
    dneg = anchor - negative + PD_EPS
    pos_d2 = jnp.sum(dpos * dpos, axis=-1, keepdims=True)            # (B, 1)
    neg_d = jnp.sqrt(jnp.sum(dneg * dneg, axis=-1, keepdims=True))   # (B, 1)
    hinge = jnp.maximum(margin - neg_d, 0.0)
    per_row = pos_d2 + hinge * hinge
    loss_ref[...] = (jnp.sum(per_row, axis=0, keepdims=True) * (1.0 / batch)
                     ).astype(loss_ref.dtype)

    # ---- fc logits for positive & negative: single fused (2B, F) matmul -------
    cat = jnp.concatenate([positive, negative], axis=0)              # (2B, F)
    logits_ref[...] = (jnp.dot(cat, wfc, preferred_element_type=jnp.float32) + bfc
                       ).astype(logits_ref.dtype)


def _f32(x):
    return x if x.dtype == jnp.float32 else x.astype(jnp.float32)


class ContrastivePallas:
    """JAX/Pallas re-implementation of Contrastive.forward (deterministic init)."""

    def __init__(self, args, margin=1.0, old_classes=2, new_classes=2, feat_dim=64,
                 key=jax.random.PRNGKey(0)):
        self.args = args
        self.margin = float(margin)
        self.feat_dim = feat_dim
        self.num_classes = old_classes + new_classes
        enc_in = args['enc_in_dim']
        # The module only makes sense when the encoder width matches feat_dim
        # (negative is both compared against anchor and passed through fc).
        assert enc_in == feat_dim, "enc_in_dim must equal feat_dim"
        assert self.num_classes <= C_PAD and HID <= HID_PAD

        ks = jax.random.split(key, 6)
        # self.vec = nn.Parameter(torch.randn(old_classes, feat_dim))
        self.vec = jax.random.normal(ks[0], (old_classes, feat_dim), jnp.float32)
        # Encoder params
        w1 = jax.random.normal(ks[1], (enc_in, HID), jnp.float32) * 0.1
        b1 = jax.random.normal(ks[2], (HID,), jnp.float32) * 0.01
        gamma = jnp.ones((HID,), jnp.float32)      # BatchNorm1d weight
        beta = jnp.zeros((HID,), jnp.float32)      # BatchNorm1d bias
        w2 = jax.random.normal(ks[3], (HID, enc_in), jnp.float32) * 0.1
        b2 = jax.random.normal(ks[4], (enc_in,), jnp.float32) * 0.01
        # fc = SimpleLinear(feat_dim, old+new) -> {'logits': x @ W + b}
        wfc = jax.random.normal(ks[5], (feat_dim, self.num_classes), jnp.float32) * 0.1
        bfc = jnp.zeros((self.num_classes,), jnp.float32)

        # ---- one-time packing into two lane-dense parameter slabs --------------
        w1p = jnp.zeros((feat_dim, HID_PAD), jnp.float32).at[:, :HID].set(w1)
        wfcp = jnp.zeros((feat_dim, C_PAD), jnp.float32).at[:, :self.num_classes].set(wfc)
        pr = jnp.zeros((8, HID_PAD), jnp.float32)
        pr = pr.at[0, :HID].set(b1)
        pr = pr.at[1, :HID].set(gamma)
        pr = pr.at[2, :HID].set(beta)
        pr = pr.at[3, :enc_in].set(b2)
        pr = pr.at[4, :self.num_classes].set(bfc)
        self.wpack = jnp.concatenate([w1p, wfcp, pr], axis=0)          # (2F+8, 128)
        self.w2p = jnp.zeros((HID_PAD, enc_in), jnp.float32).at[:HID, :].set(w2)  # (128, F)

    def __call__(self, proto, new_feat, index, negative_labels, fill, radius=None):
        B, F = proto.shape
        anchor = _f32(proto)

        # Augmentation vector so the kernel computes anchor + pvec * fill.
        if self.args['ablation'] == 'no_aug':
            pvec = jnp.zeros((B, F), jnp.float32)
        elif radius is not None:
            pvec = jnp.full((B, F), float(radius), jnp.float32)
        else:
            pvec = self.vec[index]                    # tiny gather, plain-JAX glue

        out_shape = (
            jax.ShapeDtypeStruct((B, 2 * F), jnp.float32),    # positive | negative
            jax.ShapeDtypeStruct((2 * B, C_PAD), jnp.float32),  # logits(pos) ; logits(neg)
            jax.ShapeDtypeStruct((1, 1), jnp.float32),        # contrastive loss
        )
        vmem = pl.BlockSpec(memory_space=pltpu.MemorySpace.VMEM)

        flops = (2 * B * F * HID_PAD          # Linear1
                 + 2 * B * HID_PAD * F        # Linear2
                 + 2 * (2 * B) * F * C_PAD    # fused fc
                 + 16 * B * max(F, HID_PAD))  # elementwise / BN / loss
        cost = pl.CostEstimate(
            flops=int(flops),
            transcendentals=int(B + HID_PAD),
            bytes_accessed=int(4 * (4 * B * F + self.wpack.size + self.w2p.size
                                    + B * 2 * F + 2 * B * C_PAD + 1)),
        )

        posneg, logits, loss = pl.pallas_call(
            functools.partial(_contrastive_kernel, self.margin, B, F),
            out_shape=out_shape,
            in_specs=[vmem] * 6,
            out_specs=tuple([vmem] * 3),
            cost_estimate=cost,
        )(anchor, pvec, _f32(fill), _f32(new_feat), self.wpack, self.w2p)

        positive = posneg[:, :F]
        negative = posneg[:, F:]
        logits_pos = logits[:B, :self.num_classes]
        logits_neg = logits[B:, :self.num_classes]
        return (loss[0, 0], (anchor, positive, negative), (logits_pos, logits_neg))


if __name__ == "__main__":
    # Small, deterministic example shapes consistent with the module defaults.
    B = 8
    FEAT_DIM = 64          # feat_dim default; also enc_in_dim so shapes line up
    OLD, NEW = 2, 2
    args = {'enc_in_dim': FEAT_DIM, 'ablation': 'default'}

    key = jax.random.PRNGKey(0)
    k_proto, k_feat, k_idx, k_fill, k_params = jax.random.split(key, 5)

    proto = jax.random.normal(k_proto, (B, FEAT_DIM), jnp.float32)
    new_feat = jax.random.normal(k_feat, (B, FEAT_DIM), jnp.float32)
    index = jax.random.randint(k_idx, (B,), 0, OLD)
    negative_labels = jnp.arange(B, dtype=jnp.int32) % NEW + OLD   # unused by the loss
    # torch.normal(0, 1, size=anchor.shape) -> passed in explicitly for determinism
    fill = jax.random.normal(k_fill, (B, FEAT_DIM), jnp.float32)

    model = ContrastivePallas(args, margin=1.0, old_classes=OLD, new_classes=NEW,
                              feat_dim=FEAT_DIM, key=k_params)

    loss, (anchor, positive, negative), (logits_pos, logits_neg) = model(
        proto, new_feat, index, negative_labels, fill, radius=None)

    jax.block_until_ready((loss, positive, negative, logits_pos, logits_neg))

    assert anchor.shape == (B, FEAT_DIM)
    assert positive.shape == (B, FEAT_DIM)
    assert negative.shape == (B, FEAT_DIM)
    assert logits_pos.shape == (B, OLD + NEW)
    assert logits_neg.shape == (B, OLD + NEW)
    assert loss.shape == ()
    assert bool(jnp.isfinite(loss))
    print("KERNEL_OK")
</pallas_src>

<mosaic_0001>
module attributes {stable_mosaic.version = 11 : i64} {
  func.func @_contrastive_kernel(%arg0: memref<8x64xf32, #tpu.memory_space<vmem>>, %arg1: memref<8x64xf32, #tpu.memory_space<vmem>>, %arg2: memref<8x64xf32, #tpu.memory_space<vmem>>, %arg3: memref<8x64xf32, #tpu.memory_space<vmem>>, %arg4: memref<136x128xf32, #tpu.memory_space<vmem>>, %arg5: memref<128x64xf32, #tpu.memory_space<vmem>>, %arg6: memref<8x128xf32, #tpu.memory_space<vmem>>, %arg7: memref<16x128xf32, #tpu.memory_space<vmem>>, %arg8: memref<1x1xf32, #tpu.memory_space<vmem>>) attributes {dimension_semantics = [], scalar_prefetch = 0 : i64, scratch_operands = 0 : i64, tpu.core_type = #tpu.core_type<tc>} {
    %c0 = arith.constant 0 : index
    %c0_0 = arith.constant 0 : index
    %0 = vector.load %arg0[%c0, %c0_0] : memref<8x64xf32, #tpu.memory_space<vmem>>, vector<8x64xf32>
    %c0_1 = arith.constant 0 : index
    %c0_2 = arith.constant 0 : index
    %1 = vector.load %arg1[%c0_1, %c0_2] : memref<8x64xf32, #tpu.memory_space<vmem>>, vector<8x64xf32>
    %c0_3 = arith.constant 0 : index
    %c0_4 = arith.constant 0 : index
    %2 = vector.load %arg2[%c0_3, %c0_4] : memref<8x64xf32, #tpu.memory_space<vmem>>, vector<8x64xf32>
    %3 = arith.mulf %1, %2 : vector<8x64xf32>
    %4 = arith.addf %0, %3 : vector<8x64xf32>
    %c0_5 = arith.constant 0 : index
    %c0_6 = arith.constant 0 : index
    %5 = vector.load %arg4[%c0_5, %c0_6] : memref<136x128xf32, #tpu.memory_space<vmem>>, vector<64x128xf32>
    %c64 = arith.constant 64 : index
    %c0_7 = arith.constant 0 : index
    %6 = vector.load %arg4[%c64, %c0_7] : memref<136x128xf32, #tpu.memory_space<vmem>>, vector<64x128xf32>
    %c128 = arith.constant 128 : index
    %c0_8 = arith.constant 0 : index
    %7 = vector.load %arg4[%c128, %c0_8] : memref<136x128xf32, #tpu.memory_space<vmem>>, vector<8x128xf32>
    %8 = vector.extract_strided_slice %7 {offsets = [0, 0], sizes = [1, 128], strides = [1, 1]} : vector<8x128xf32> to vector<1x128xf32>
    %9 = vector.extract_strided_slice %7 {offsets = [1, 0], sizes = [1, 128], strides = [1, 1]} : vector<8x128xf32> to vector<1x128xf32>
    %10 = vector.extract_strided_slice %7 {offsets = [2, 0], sizes = [1, 128], strides = [1, 1]} : vector<8x128xf32> to vector<1x128xf32>
    %11 = vector.extract_strided_slice %7 {offsets = [3, 0], sizes = [1, 64], strides = [1, 1]} : vector<8x128xf32> to vector<1x64xf32>
    %12 = vector.extract_strided_slice %7 {offsets = [4, 0], sizes = [1, 128], strides = [1, 1]} : vector<8x128xf32> to vector<1x128xf32>
    %c0_9 = arith.constant 0 : index
    %c0_10 = arith.constant 0 : index
    %13 = vector.load %arg3[%c0_9, %c0_10] : memref<8x64xf32, #tpu.memory_space<vmem>>, vector<8x64xf32>
    %cst = arith.constant dense<0.000000e+00> : vector<8x128xf32>
    %14 = tpu.matmul %13, %5, %cst {dimension_numbers = #tpu.dot_dimension_numbers<[1], [0], [0], [1], [0, 0, 1, 1], [], []>} : vector<8x64xf32>, vector<64x128xf32>, vector<8x128xf32> -> vector<8x128xf32>
    %15 = vector.broadcast %8 : vector<1x128xf32> to vector<8x128xf32>
    %16 = arith.addf %14, %15 : vector<8x128xf32>
    %cst_11 = arith.constant 0.000000e+00 : f32
    %17 = vector.broadcast %cst_11 : f32 to vector<8x128xf32>
    %18 = arith.maximumf %16, %17 : vector<8x128xf32>
    %cst_12 = arith.constant dense<0.000000e+00> : vector<128xf32>
    %19 = vector.multi_reduction <add>, %18, %cst_12 [0] : vector<8x128xf32> to vector<128xf32>
    %20 = vector.shape_cast %19 : vector<128xf32> to vector<1x128xf32>
    %cst_13 = arith.constant 8.000000e+00 : f32
    %21 = vector.broadcast %cst_13 : f32 to vector<1x128xf32>
    %22 = arith.divf %20, %21 : vector<1x128xf32>
    %23 = vector.broadcast %22 : vector<1x128xf32> to vector<8x128xf32>
    %24 = arith.subf %18, %23 : vector<8x128xf32>
    %25 = vector.broadcast %22 : vector<1x128xf32> to vector<8x128xf32>
    %26 = arith.subf %18, %25 : vector<8x128xf32>
    %27 = arith.mulf %24, %26 : vector<8x128xf32>
    %cst_14 = arith.constant dense<0.000000e+00> : vector<128xf32>
    %28 = vector.multi_reduction <add>, %27, %cst_14 [0] : vector<8x128xf32> to vector<128xf32>
    %29 = vector.shape_cast %28 : vector<128xf32> to vector<1x128xf32>
    %cst_15 = arith.constant 8.000000e+00 : f32
    %30 = vector.broadcast %cst_15 : f32 to vector<1x128xf32>
    %31 = arith.divf %29, %30 : vector<1x128xf32>
    %32 = vector.broadcast %22 : vector<1x128xf32> to vector<8x128xf32>
    %33 = arith.subf %18, %32 : vector<8x128xf32>
    %cst_16 = arith.constant 9.99999974E-6 : f32
    %34 = vector.broadcast %cst_16 : f32 to vector<1x128xf32>
    %35 = arith.addf %31, %34 : vector<1x128xf32>
    %36 = math.rsqrt %35 : vector<1x128xf32>
    %37 = vector.broadcast %36 : vector<1x128xf32> to vector<8x128xf32>
    %38 = arith.mulf %33, %37 : vector<8x128xf32>
    %39 = vector.broadcast %9 : vector<1x128xf32> to vector<8x128xf32>
    %40 = arith.mulf %38, %39 : vector<8x128xf32>
    %41 = vector.broadcast %10 : vector<1x128xf32> to vector<8x128xf32>
    %42 = arith.addf %40, %41 : vector<8x128xf32>
    %c0_17 = arith.constant 0 : index
    %c0_18 = arith.constant 0 : index
    %43 = vector.load %arg5[%c0_17, %c0_18] : memref<128x64xf32, #tpu.memory_space<vmem>>, vector<128x64xf32>
    %cst_19 = arith.constant dense<0.000000e+00> : vector<8x64xf32>
    %44 = tpu.matmul %42, %43, %cst_19 {dimension_numbers = #tpu.dot_dimension_numbers<[1], [0], [0], [1], [0, 0, 1, 1], [], []>} : vector<8x128xf32>, vector<128x64xf32>, vector<8x64xf32> -> vector<8x64xf32>
    %45 = vector.broadcast %11 : vector<1x64xf32> to vector<8x64xf32>
    %46 = arith.addf %44, %45 : vector<8x64xf32>
    %47 = tpu.concatenate %4, %46 in 1 : vector<8x64xf32>, vector<8x64xf32> -> vector<8x128xf32>
    %c0_20 = arith.constant 0 : index
    %c0_21 = arith.constant 0 : index
    %48 = vector.load %arg6[%c0_20, %c0_21] : memref<8x128xf32, #tpu.memory_space<vmem>>, vector<8x128xf32>
    tpu.vector_store %arg6[%c0_20, %c0_21], %47 {strides = array<i32>} : memref<8x128xf32, #tpu.memory_space<vmem>>, vector<8x128xf32>,
    %49 = arith.subf %0, %4 : vector<8x64xf32>
    %cst_22 = arith.constant 9.99999997E-7 : f32
    %50 = vector.broadcast %cst_22 : f32 to vector<8x64xf32>
    %51 = arith.addf %49, %50 : vector<8x64xf32>
    %52 = arith.subf %0, %46 : vector<8x64xf32>
    %cst_23 = arith.constant 9.99999997E-7 : f32
    %53 = vector.broadcast %cst_23 : f32 to vector<8x64xf32>
    %54 = arith.addf %52, %53 : vector<8x64xf32>
    %55 = arith.mulf %51, %51 : vector<8x64xf32>
    %cst_24 = arith.constant dense<0.000000e+00> : vector<8xf32>
    %56 = vector.multi_reduction <add>, %55, %cst_24 [1] : vector<8x64xf32> to vector<8xf32>
    %57 = vector.shape_cast %56 : vector<8xf32> to vector<8x1xf32>
    %58 = arith.mulf %54, %54 : vector<8x64xf32>
    %cst_25 = arith.constant dense<0.000000e+00> : vector<8xf32>
    %59 = vector.multi_reduction <add>, %58, %cst_25 [1] : vector<8x64xf32> to vector<8xf32>
    %60 = vector.shape_cast %59 : vector<8xf32> to vector<8x1xf32>
    %61 = math.sqrt %60 : vector<8x1xf32>
    %cst_26 = arith.constant 1.000000e+00 : f32
    %62 = vector.broadcast %cst_26 : f32 to vector<8x1xf32>
    %63 = arith.subf %62, %61 : vector<8x1xf32>
    %cst_27 = arith.constant 0.000000e+00 : f32
    %64 = vector.broadcast %cst_27 : f32 to vector<8x1xf32>
    %65 = arith.maximumf %63, %64 : vector<8x1xf32>
    %66 = arith.mulf %65, %65 : vector<8x1xf32>
    %67 = arith.addf %57, %66 : vector<8x1xf32>
    %cst_28 = arith.constant dense<0.000000e+00> : vector<1xf32>
    %68 = vector.multi_reduction <add>, %67, %cst_28 [0] : vector<8x1xf32> to vector<1xf32>
    %69 = vector.shape_cast %68 : vector<1xf32> to vector<1x1xf32>
    %cst_29 = arith.constant 1.250000e-01 : f32
    %70 = vector.broadcast %cst_29 : f32 to vector<1x1xf32>
    %71 = arith.mulf %69, %70 : vector<1x1xf32>
    %c0_30 = arith.constant 0 : index
    %c0_31 = arith.constant 0 : index
    %72 = vector.load %arg8[%c0_30, %c0_31] : memref<1x1xf32, #tpu.memory_space<vmem>>, vector<1x1xf32>
    tpu.vector_store %arg8[%c0_30, %c0_31], %71 {strides = array<i32>} : memref<1x1xf32, #tpu.memory_space<vmem>>, vector<1x1xf32>,
    %73 = tpu.concatenate %4, %46 in 0 : vector<8x64xf32>, vector<8x64xf32> -> vector<16x64xf32>
    %cst_32 = arith.constant dense<0.000000e+00> : vector<16x128xf32>
    %74 = tpu.matmul %73, %6, %cst_32 {dimension_numbers = #tpu.dot_dimension_numbers<[1], [0], [0], [1], [0, 0, 1, 1], [], []>} : vector<16x64xf32>, vector<64x128xf32>, vector<16x128xf32> -> vector<16x128xf32>
    %75 = vector.broadcast %12 : vector<1x128xf32> to vector<16x128xf32>
    %76 = arith.addf %74, %75 : vector<16x128xf32>
    %c0_33 = arith.constant 0 : index
    %c0_34 = arith.constant 0 : index
    %77 = vector.load %arg7[%c0_33, %c0_34] : memref<16x128xf32, #tpu.memory_space<vmem>>, vector<16x128xf32>
    tpu.vector_store %arg7[%c0_33, %c0_34], %76 {strides = array<i32>} : memref<16x128xf32, #tpu.memory_space<vmem>>, vector<16x128xf32>,
    return
  }
}

</mosaic_0001>

<bundles_post_ra>
// kernel: tpu_custom_call.1
= control target key start
LH: loop header
LB: loop body
LE: loop exit
PB: predicated region body
PF: predicated region fallthrough
CT: control target
= control target key end

     0   :  { %14 = vsyncpa [#allocation3], 0  ;;  %s553_s0 = inlined_call_operand.vmem [shape: f32[8,64], index: 0, kind: input, shape index: {}]   ;;  %s554_s1 = inlined_call_operand.vmem [shape: f32[8,64], index: 1, kind: input, shape index: {}]   ;;  %s555_s2 = inlined_call_operand.vmem [shape: f32[8,64], index: 2, kind: input, shape index: {}]   ;;  %s556_s3 = inlined_call_operand.vmem [shape: f32[8,64], index: 3, kind: input, shape index: {}]   ;;  %s557_s4 = inlined_call_operand.vmem [shape: f32[136,128], index: 4, kind: input, shape index: {}]   ;;  %s558_s5 = inlined_call_operand.vmem [shape: f32[128,64], index: 5, kind: input, shape index: {}]   ;;  %s559_s6 = inlined_call_operand.hbm [shape: f32[8,128], index: 6, kind: output, shape index: {0}]   ;;  %s560_s7 = inlined_call_operand.hbm [shape: f32[16,128], index: 7, kind: output, shape index: {1}]   ;;  %s561_s8 = inlined_call_operand.hbm [shape: f32[1,1], index: 8, kind: output, shape index: {2}]  }
   0x1   :  { %v40_v0 = vld [vmem:[%s557_s4 + $0x38] sm:$0xff]  ;;  %v39_v1 = vld [vmem:[%s557_s4 + $0x30] sm:$0xff]  ;;  %v38_v2 = vld [vmem:[%s557_s4 + $0x28] sm:$0xff] }
   0x2   :  { %64 = vmatpush.msra.mxu0 %v40_v0 }
   0x4   :  { %65 = vmatpush.msra.mxu0 %v39_v1 }
   0x5   :  { %15 = vsyncpa [#allocation5], 0  ;;  %v37_v3 = vld [vmem:[%s557_s4 + $0x20] sm:$0xff]  ;;  %v36_v4 = vld [vmem:[%s557_s4 + $0x18] sm:$0xff]  ;;  %vm52_vm0 = vcmask 523264   ;;  %v368_v9 = vmov 8.0  }
   0x6   :  { %66 = vmatpush.msra.mxu0 %v38_v2  ;;  %v35_v5 = vld [vmem:[%s557_s4 + $0x10] sm:$0xff]  ;;  %v34_v6 = vld [vmem:[%s557_s4 + $0x8] sm:$0xff]  ;;  %v33_v7 = vld [vmem:[%s557_s4] sm:$0xff]  ;;  %286 = vrcp.f32 %v368_v9  ;;  %s234_s10 = sshll.u32 %s559_s6, 4  ;;  %s371_s11 = smov [#allocation4]   ;;  %vm194_vm7 = vcmask 0   ;;  %s235_s10 = int_to_ptr.hbm [resolvable:$true] %s234_s10 }
   0x7   :  { %v50_v8 = vld [vmem:[%s556_s3] sm:$0xff]  ;;  %v131_v14 = vld [vmem:[%s558_s5 + $0x78] sm:$0xff]  ;;  %v130_v17 = vld [vmem:[%s558_s5 + $0x70] sm:$0xff]  ;;  %s242_s12 = sshll.u32 %s371_s11, 4  ;;  %s244_s15 = sshll.u32 %s560_s7, 4  ;;  %s243_s12 = int_to_ptr.vmem [resolvable:$true] %s242_s12  ;;  %s245_s15 = int_to_ptr.hbm [resolvable:$true] %s244_s15 }
   0x8   :  { %67 = vmatpush.msra.mxu0 %v37_v3  ;;  %v451_v10 = vld [vmem:[%s557_s4 + $0x80] sm:$0xff]  ;;  %133 = vmatpush.msra.mxu1 %v131_v14  ;;  %v129_v20 = vld [vmem:[%s558_s5 + $0x68] sm:$0xff]  ;;  %v127_v25 = vld [vmem:[%s558_s5 + $0x58] sm:$0xff]  ;;  %s372_s6 = smov 128   ;;  %s373_s16 = smov 8  }
   0x9   :  { %v51_v12 = vperm.slane %v451_v10, 0  ;;  %v128_v22 = vld [vmem:[%s558_s5 + $0x60] sm:$0xff]  ;;  %v126_v27 = vld [vmem:[%s558_s5 + $0x50] sm:$0xff]  ;;  %v125_v30 = vld [vmem:[%s558_s5 + $0x48] sm:$0xff]  ;;  %v112_v9 = vperm.slane %v451_v10, 1  ;;  %s374_s7 = smov [#allocation6]  }
   0xa   :  { %68 = vmatpush.msra.mxu0 %v36_v4  ;;  %134 = vmatpush.msra.mxu1 %v130_v17  ;;  %v124_v32 = vld [vmem:[%s558_s5 + $0x40] sm:$0xff]  ;;  %v123_v34 = vld [vmem:[%s558_s5 + $0x38] sm:$0xff]  ;;  %v122_v36 = vld [vmem:[%s558_s5 + $0x30] sm:$0xff]  ;;  %s258_s19 = sshll.u32 %s561_s8, 4  ;;  %s259_s19 = int_to_ptr.hbm [resolvable:$true] %s258_s19 }
   0xb   :  { %v121_v38 = vld [vmem:[%s558_s5 + $0x28] sm:$0xff]  ;;  %v120_v40 = vld [vmem:[%s558_s5 + $0x20] sm:$0xff]  ;;  %v119_v42 = vld [vmem:[%s558_s5 + $0x18] sm:$0xff] }
   0xc   :  { %69 = vmatpush.msra.mxu0 %v35_v5  ;;  %v287_v11 = vpop.eup %286  ;;  %135 = vmatpush.msra.mxu1 %v129_v20  ;;  %v118_v44 = vld [vmem:[%s558_s5 + $0x10] sm:$0xff]  ;;  %v117_v46 = vld [vmem:[%s558_s5 + $0x8] sm:$0xff]  ;;  %v116_v48 = vld [vmem:[%s558_s5] sm:$0xff]  ;;  %s256_s5 = sshll.u32 %s374_s7, 4  ;;  %s257_s5 = int_to_ptr.vmem [resolvable:$true] %s256_s5 }
   0xd   :  { %v84_v13 = vmul.f32 8.0, %v287_v11  ;;  %vm88_vm1 = vweird.f32 %v287_v11  ;;  %v48_v51 = vld [vmem:[%s557_s4 + $0x78] sm:$0xff]  ;;  %v47_v52 = vld [vmem:[%s557_s4 + $0x70] sm:$0xff]  ;;  %v46_v54 = vld [vmem:[%s557_s4 + $0x68] sm:$0xff] }
   0xe   :  { %70 = vmatpush.msra.mxu0 %v34_v6  ;;  %136 = vmatpush.msra.mxu1 %v128_v22  ;;  %v45_v56 = vld [vmem:[%s557_s4 + $0x60] sm:$0xff]  ;;  %v44_v60 = vld [vmem:[%s557_s4 + $0x58] sm:$0xff]  ;;  %v43_v61 = vld [vmem:[%s557_s4 + $0x50] sm:$0xff] }
   0xf   :  { %v85_v18 = vsub.f32 1.0, %v84_v13  ;;  %210 = vmatpush.msra.mxu2 %v48_v51  ;;  %v29_v57 = vld [vmem:[%s554_s1] sm:$0xff]  ;;  %v42_v0 = vld [vmem:[%s557_s4 + $0x48] sm:$0xff]  ;;  %v114_v13 = vperm.slane %v451_v10, 2 }
  0x10   :  { %71 = vmatpush.msra.mxu0 %v33_v7  ;;  %137 = vmatpush.msra.mxu1 %v127_v25  ;;  %v30_v58 = vld [vmem:[%s555_s2] sm:$0xff] }
  0x11   :  { %276 = vmatmul.msk.f32.vlgmr.msra.gmra.mxu0 %vm52_vm0, %v50_v8  ;;  %v86_v23 = vmul.f32 %v287_v11, %v85_v18  ;;  %211 = vmatpush.msra.mxu2 %v47_v52  ;;  %v31_v62 = vmul.f32 %v30_v58, %v29_v57  ;;  %v28_v63 = vld [vmem:[%s553_s0] sm:$0xff]  ;;  %s369_s0 = smov 64  }
  0x12   :  { %138 = vmatpush.msra.mxu1 %v126_v27  ;;  %v41_v1 = vld [vmem:[%s557_s4 + $0x40] sm:$0xff]  ;;  %v196_v27 = vperm.slane %v451_v10, 4  ;;  %s370_s4 = smov [#allocation2]  }
  0x13   :  { %v87_v28 = vadd.f32 %v287_v11, %v86_v23  ;;  %212 = vmatpush.msra.mxu2 %v46_v54  ;;  %v32_v2 = vadd.f32 %v31_v62, %v28_v63  ;;  %s232_s29 = sshll.u32 %s370_s4, 4  ;;  %s233_s29 = int_to_ptr.vmem [resolvable:$true] %s232_s29 }
  0x14   :  { %139 = vmatpush.msra.mxu1 %v125_v30 }
  0x15   :  { %v89_v33 = vsel %vm88_vm1, %v287_v11, %v87_v28  ;;  %213 = vmatpush.msra.mxu2 %v45_v56  ;;  %v159_v20 = vsub.f32 %v28_v63, %v32_v2 }
  0x16   :  { %140 = vmatpush.msra.mxu1 %v124_v32 }
  0x17   :  { %214 = vmatpush.msra.mxu2 %v44_v60  ;;  %v160_v23 = vadd.f32 1e-06, %v159_v20 }
  0x18   :  { %141 = vmatpush.msra.mxu1 %v123_v34 }
  0x19   :  { %215 = vmatpush.msra.mxu2 %v43_v61  ;;  %v163_v25 = vmul.f32 %v160_v23, %v160_v23 }
  0x1a   :  { %142 = vmatpush.msra.mxu1 %v122_v36 }
  0x1b   :  { %216 = vmatpush.msra.mxu2 %v42_v0 }
  0x1c   :  { %143 = vmatpush.msra.mxu1 %v121_v38 }
  0x1d   :  { %217 = vmatpush.msra.mxu2 %v41_v1 }
  0x1e   :  { %144 = vmatpush.msra.mxu1 %v120_v40  ;;  %277 = vmatmul.msk.f32.vlgmr.msra.gmra.mxu2 %vm52_vm0, %v32_v2 }
  0x20   :  { %145 = vmatpush.msra.mxu1 %v119_v42 }
  0x22   :  { %146 = vmatpush.msra.mxu1 %v118_v44 }
  0x24   :  { %147 = vmatpush.msra.mxu1 %v117_v46 }
  0x26   :  { %148 = vmatpush.msra.mxu1 %v116_v48 }
  0x8e   :  { %v73_v15 = vpop.f32.mrf.mxu0 }
  0x8f   :  { %v74_v16 = vadd.f32 %v73_v15, %v51_v12 }
  0x91   :  { %v76_v19 = vmax.f32 %v74_v16, 0.0  ;;  %v132_v16 = vperm.slane %v451_v10, 3 }
  0x93   :  { %v77_v21 = vrot.slane %v76_v19, 4 }
  0x95   :  { %v78_v24 = vadd.f32 %v77_v21, %v76_v19 }
  0x97   :  { %v79_v26 = vrot.slane %v78_v24, 2 }
  0x99   :  { %v80_v29 = vadd.f32 %v79_v26, %v78_v24  ;;  %v164_v26 = vsel %vm52_vm0, %v163_v25, 0.0 }
  0x9b   :  { %v81_v31 = vrot.slane %v80_v29, 1 }
  0x9d   :  { %v82_v35 = vadd.f32 %v81_v31, %v80_v29 }
  0x9f   :  { %v90_v37 = vmul.f32 %v89_v33, %v82_v35 }
  0xa1   :  { %v91_v39 = vsub.f32 %v76_v19, %v90_v37  ;;  %v219_v28 = vpop.f32.mrf.mxu2 }
  0xa2   :  { %v220_v29 = vadd.f32 %v219_v28, %v196_v27 }
  0xa3   :  { %v92_v41 = vmul.f32 %v91_v39, %v91_v39 }
  0xa4   :  { %225 = vst [vmem:[#allocation4] sm:$0xff] %v220_v29 }
  0xa5   :  { %v93_v43 = vrot.slane %v92_v41, 4 }
  0xa7   :  { %v94_v45 = vadd.f32 %v93_v43, %v92_v41 }
  0xa9   :  { %v95_v47 = vrot.slane %v94_v45, 2 }
  0xab   :  { %v96_v49 = vadd.f32 %v95_v47, %v94_v45 }
  0xad   :  { %v97_v50 = vrot.slane %v96_v49, 1 }
  0xaf   :  { %v98_v53 = vadd.f32 %v97_v50, %v96_v49 }
  0xb1   :  { %v99_v55 = vmul.f32 %v98_v53, %v89_v33 }
  0xb3   :  { %v100_v59 = vadd.f32 1e-05, %v99_v55 }
  0xb5   :  { %288 = vrsqrt.f32 %v100_v59  ;;  %vm107_vm3 = vweird.f32 %v100_v59 }
  0xbb   :  { %v289_v3 = vpop.eup %288 }
  0xbc   :  { %v102_v4 = vmul.f32 %v289_v3, %v100_v59  ;;  %vm108_vm2 = vweird.f32 %v289_v3 }
  0xbd   :  { %vm109_vm4 = vmor %vm107_vm3, %vm108_vm2 }
  0xbe   :  { %v103_v5 = vmul.f32 %v289_v3, %v102_v4 }
  0xc0   :  { %v104_v6 = vmul.f32 0.5, %v103_v5 }
  0xc2   :  { %v105_v7 = vsub.f32 1.5, %v104_v6 }
  0xc4   :  { %v106_v8 = vmul.f32 %v289_v3, %v105_v7 }
  0xc6   :  { %v110_v11 = vsel %vm109_vm4, %v289_v3, %v106_v8 }
  0xc7   :  { %v111_v12 = vmul.f32 %v110_v11, %v91_v39 }
  0xc9   :  { %v113_v14 = vmul.f32 %v112_v9, %v111_v12 }
  0xcb   :  { %v115_v15 = vadd.f32 %v114_v13, %v113_v14 }
  0xcd   :  { %149 = vmatmul.f32.vlgmr.msra.gmra.mxu1 %v115_v15 }
 0x14a   :  { %v150_v17 = vpop.f32.mrf.mxu1 }
 0x14b   :  { %v151_v18 = vadd.f32 %v150_v17, %v132_v16 }
 0x14d   :  { %154 = vrot.lane.b32.xlu1 %v151_v18, %s369_s0  ;;  %278 = vmatmul.msk.f32.gmra.mxu2 %vm52_vm0, %v151_v18  ;;  %v161_v19 = vsub.f32 %v28_v63, %v151_v18 }
 0x14f   :  { %v162_v21 = vadd.f32 1e-06, %v161_v19 }
 0x151   :  { %v167_v22 = vmul.f32 %v162_v21, %v162_v21 }
 0x153   :  { %v168_v24 = vsel %vm52_vm0, %v167_v22, 0.0 }
 0x154   :  { %169 = vadd.xlane.f32.xlu0 %v168_v24 }
 0x15c   :  { %165 = vadd.xlane.f32.xlu0 %v164_v26 }
 0x1bf   :  { %v155_v30 = vpop.permute.xlu1 %154 }
 0x1c0   :  { %v157_v31 = vsel %vm52_vm0, %v32_v2, %v155_v30 }
 0x1c1   :  { %158 = vst [vmem:[#allocation2] sm:$0xff] %v157_v31 }
 0x1c2   :  { %237 = dma.vmem_to_hbm [thread:$0]  %s233_s29, 128, %s235_s10, [#allocation3]  }
 0x1c7   :  { %v170_v32 = vpop.xlane.xlu0 %169 }
 0x1c8   :  { %290 = vrsqrt.f32 %v170_v32  ;;  %vm178_vm5 = vcmp.eq.f32.partialorder %v170_v32, inf  ;;  %v181_v41 = vand.u32 2147483648, %v170_v32  ;;  %vm180_vm6 = vcmp.eq.f32.partialorder %v170_v32, 0.0 }
 0x1ce   :  { %v291_v10 = vpop.eup %290 }
 0x1cf   :  { %v172_v33 = vmul.f32 %v291_v10, %v170_v32  ;;  %v166_v46 = vpop.xlane.xlu0 %165 }
 0x1d0   :  { %v222_v34 = vpop.f32.mrf.mxu2 }
 0x1d1   :  { %v223_v35 = vadd.f32 %v222_v34, %v196_v27  ;;  %v173_v36 = vmul.f32 %v291_v10, %v172_v33 }
 0x1d3   :  { %226 = vst [vmem:[#allocation4 + $0x8] sm:$0xff] %v223_v35  ;;  %v174_v37 = vmul.f32 0.5, %v173_v36 }
 0x1d4   :  { %250 = dma.vmem_to_hbm [thread:$0]  %s243_s12, 256, %s245_s15, [#allocation5], %s372_s6, %s372_s6, %s373_s16  }
 0x1d5   :  { %v175_v38 = vsub.f32 1.5, %v174_v37 }
 0x1d7   :  { %v176_v39 = vmul.f32 %v291_v10, %v175_v38 }
 0x1d9   :  { %v177_v40 = vmul.f32 %v176_v39, %v170_v32 }
 0x1db   :  { %v179_v42 = vsel %vm178_vm5, %v170_v32, %v177_v40 }
 0x1dc   :  { %v182_v43 = vsel %vm180_vm6, %v181_v41, %v179_v42 }
 0x1dd   :  { %v183_v44 = vsub.f32 1.0, %v182_v43 }
 0x1df   :  { %v184_v45 = vmax.f32 %v183_v44, 0.0 }
 0x1e1   :  { %v185_v47 = vmul.f32 %v184_v45, %v184_v45 }
 0x1e3   :  { %v186_v48 = vadd.f32 %v185_v47, %v166_v46 }
 0x1e5   :  { %v187_v49 = vrot.slane %v186_v48, 4 }
 0x1e7   :  { %v188_v50 = vadd.f32 %v187_v49, %v186_v48 }
 0x1e9   :  { %v189_v51 = vrot.slane %v188_v50, 2 }
 0x1eb   :  { %v190_v52 = vadd.f32 %v189_v51, %v188_v50 }
 0x1ed   :  { %v191_v53 = vrot.slane %v190_v52, 1 }
 0x1ef   :  { %v192_v54 = vadd.f32 %v191_v53, %v190_v52 }
 0x1f1   :  { %v193_v55 = vmul.f32 0.125, %v192_v54 }
 0x1f3   :  { %195 = vst.msk [vmem:[#allocation6] sm:$0x1] %vm194_vm7, %v193_v55 }
 0x1f4   :  { %261 = dma.vmem_to_hbm [thread:$0]  %s257_s5, 16, %s259_s19, [#allocation5]  }
 0x1f5   :  { %364 = dma.done.wait [#allocation3], 128  }
 0x1f6   :  { %365 = vsyncadd [#allocation3], 4294967168 }
 0x1f7   :  { %366 = dma.done.wait [#allocation5], 272  }
 0x1f8   :  { %367 = vsyncadd [#allocation5], 4294967024 }
 0x1f9   :  { %274 = vsyncpa [#allocation3], 1 }
 0x1fa   :  { %275 = vsyncpa [#allocation5], 1 }

</bundles_post_ra>
